<compile_context>
chip_gen: v7x
topology: tpu7x:2x2x1
jax: 0.10.0
libtpu: 0.0.40
codegen_flags: <defaults>
</compile_context>

<pallas_src>
import math

import jax
import jax.numpy as jnp
import numpy as np
from jax.experimental import pallas as pl
from jax.experimental.pallas import tpu as pltpu

NUM_UNITS = 32   # self.num_units
NUM_TEST = 16    # self.num_test = 32 // 2
SELF_SIZE = 4
OTHER_SIZE = 4
FOOD_SIZE = 2
LN_EPS = 1e-5
OUT_WIDTH = 128  # lane-dense output slab; logical output lives in cols 0:2


def _round_up(x, m):
    return ((x + m - 1) // m) * m


# ----------------------------------------------------------------------------
# Kernel: one row-tile of the flattened [n_agents*B, obs] input per grid step.
# ----------------------------------------------------------------------------
def make_kernel(n_other, compute_dtype):
    S = n_other * NUM_TEST
    inv_sqrt = 1.0 / math.sqrt(NUM_TEST)

    def kernel(x_ref, w1_ref, b1_ref, w2_ref, b2_ref, ln_ref, tile_ref,
               blk_ref, fold_ref, aw1h2_ref, aw1o_ref, aw2_ref, ab12_ref,
               aw3b_ref, out_ref):
        x = x_ref[...]                                            # [TM, obs]

        # ----- fused (block-diagonal) encoder layer 1: oa_0..oa_{n-1} | en | goal -----
        h1 = jnp.maximum(
            jnp.dot(x, w1_ref[...], preferred_element_type=jnp.float32) + b1_ref[...],
            0.0)                                                  # [TM, H1] f32

        # ----- fused encoder layer 2 -----
        h2 = jnp.maximum(
            jnp.dot(h1.astype(compute_dtype), w2_ref[...],
                    preferred_element_type=jnp.float32) + b2_ref[...],
            0.0)                                                  # [TM, H2] f32

        # ----- scaled dot-product attention over neighbors, slab form -----
        # tile_ref [H2, S]: broadcasts self_out (cols S..S+16 of h2) across every
        #                   16-lane neighbor segment via the MXU (no concat/relayout).
        # blk_ref  [S, S] : 16x16 blocks of ones -> per-segment score broadcast.
        # fold_ref [S, 16]: stacked identities   -> fold weighted slab to 16 lanes.
        self_tiled = jnp.dot(h2, tile_ref[...],
                             preferred_element_type=jnp.float32)  # [TM, S]
        other_slab = h2[:, :S]                                    # lane-0 aligned slice
        prod = self_tiled * other_slab
        scores = jnp.dot(prod, blk_ref[...],
                         preferred_element_type=jnp.float32) * inv_sqrt      # [TM, S]
        m = jnp.max(scores, axis=1, keepdims=True)
        e = jnp.exp(scores - m)
        denom = jnp.sum(e, axis=1, keepdims=True)                 # = 16 * softmax denom
        attn = e * (float(NUM_TEST) / denom)                      # per-segment softmax weight
        agg = jnp.dot(attn * other_slab, fold_ref[...],
                      preferred_element_type=jnp.float32)         # [TM, 16]

        # ----- oa_attention: LayerNorm(16) + ReLU -----
        mu = jnp.mean(agg, axis=1, keepdims=True)
        var = jnp.mean((agg - mu) ** 2, axis=1, keepdims=True)
        normed = (agg - mu) * jax.lax.rsqrt(var + LN_EPS)
        ln = ln_ref[...]
        other_ln = jnp.maximum(normed * ln[0:1, :] + ln[1:2, :], 0.0)

        # ----- actor_layer; first layer fused into h2 lane space -----
        ab12 = ab12_ref[...]
        z1 = (jnp.dot(h2, aw1h2_ref[...], preferred_element_type=jnp.float32)
              + jnp.dot(other_ln, aw1o_ref[...], preferred_element_type=jnp.float32)
              + ab12[0:1, :])
        z1 = jnp.where(z1 > 0, z1, 0.01 * z1)                     # LeakyReLU(0.01)
        z2 = jnp.dot(z1, aw2_ref[...], preferred_element_type=jnp.float32) + ab12[1:2, :]
        z2 = jnp.where(z2 > 0, z2, 0.01 * z2)
        aw3b = aw3b_ref[...]
        z3 = jnp.tanh(jnp.dot(z2, aw3b[:NUM_UNITS, :],
                              preferred_element_type=jnp.float32)
                      + aw3b[NUM_UNITS:, :])                      # [TM, 128]
        out_ref[...] = z3                                         # unmasked lane-dense store

    return kernel


# ----------------------------------------------------------------------------
# Host-side packing of the 21 raw parameter arrays into 13 fused inputs.
# Column layout: [oa_0 .. oa_{n_other-1} | en | goal].
# ----------------------------------------------------------------------------
def pack_params(params, n_good, compute_dtype=jnp.float32):
    (en_w1, en_b1, en_w2, en_b2, oa_w1, oa_b1, oa_w2, oa_b2,
     ln_g, ln_b, g_w1, g_b1, g_w2, g_b2,
     a_w1, a_b1, a_w2, a_b2, a_w3, a_b3) = params
    n_other = n_good - 1
    obs = SELF_SIZE + n_other * 4 + FOOD_SIZE
    H1 = (n_other + 2) * NUM_UNITS
    S = n_other * NUM_TEST
    H2 = S + 2 * NUM_TEST

    # Fused layer-1 weight (block structure, neighbor blocks first).
    w1f = np.zeros((obs, H1), np.float32)
    oa_w1_np = np.asarray(oa_w1)
    for j in range(n_other):
        c0 = NUM_UNITS * j
        w1f[SELF_SIZE + 2 * j: SELF_SIZE + 2 * j + 2, c0:c0 + NUM_UNITS] = oa_w1_np[:2, :]
        r0 = SELF_SIZE + 2 * n_other + 2 * j
        w1f[r0:r0 + 2, c0:c0 + NUM_UNITS] = oa_w1_np[2:4, :]
    w1f[:SELF_SIZE, n_other * NUM_UNITS: n_other * NUM_UNITS + NUM_UNITS] = np.asarray(en_w1)
    w1f[obs - FOOD_SIZE:, H1 - NUM_UNITS:] = np.asarray(g_w1)
    b1f = jnp.concatenate([oa_b1] * n_other + [en_b1, g_b1], axis=1)        # [1, H1]

    # Fused layer-2 weight (block-diagonal).
    w2f = np.zeros((H1, H2), np.float32)
    oa_w2_np = np.asarray(oa_w2)
    for j in range(n_other):
        w2f[j * NUM_UNITS:(j + 1) * NUM_UNITS, j * NUM_TEST:(j + 1) * NUM_TEST] = oa_w2_np
    w2f[n_other * NUM_UNITS:(n_other + 1) * NUM_UNITS, S:S + NUM_TEST] = np.asarray(en_w2)
    w2f[H1 - NUM_UNITS:, H2 - NUM_TEST:] = np.asarray(g_w2)
    b2f = jnp.concatenate([oa_b2] * n_other + [en_b2, g_b2], axis=1)        # [1, H2]

    ln_gb = jnp.concatenate([ln_g, ln_b], axis=0)                           # [2, 16]

    # Attention constants.
    seg_ids = np.arange(S) // NUM_TEST
    blk_ones = (seg_ids[:, None] == seg_ids[None, :]).astype(np.float32)    # [S, S]
    lane_ids = np.arange(S) % NUM_TEST
    fold = (lane_ids[:, None] == np.arange(NUM_TEST)[None, :]).astype(np.float32)  # [S, 16]
    tile_self = np.zeros((H2, S), np.float32)                               # self_out -> slab
    tile_self[S:S + NUM_TEST, :] = fold.T

    # Actor layer: first layer split into an h2-lane-space part + other_ln part.
    a_w1_np = np.asarray(a_w1)                                              # [48, 32]
    aw1h2 = np.zeros((H2, NUM_UNITS), np.float32)
    aw1h2[S:S + NUM_TEST, :] = a_w1_np[:NUM_TEST, :]                        # self_out rows
    aw1h2[S + NUM_TEST:, :] = a_w1_np[NUM_TEST:2 * NUM_TEST, :]             # food_out rows
    aw1o = a_w1_np[2 * NUM_TEST:, :]                                        # [16, 32]

    ab12 = jnp.concatenate([a_b1, a_b2], axis=0)                            # [2, 32]
    aw3b_wide = np.zeros((NUM_UNITS + 1, OUT_WIDTH), np.float32)            # lane-dense head
    aw3b_wide[:NUM_UNITS, :2] = np.asarray(a_w3)
    aw3b_wide[NUM_UNITS, :2] = np.asarray(a_b3).reshape(-1)

    wd = compute_dtype
    return [jnp.asarray(w1f, dtype=wd), b1f, jnp.asarray(w2f, dtype=wd), b2f,
            ln_gb, jnp.asarray(tile_self), jnp.asarray(blk_ones), jnp.asarray(fold),
            jnp.asarray(aw1h2), jnp.asarray(aw1o),
            jnp.asarray(a_w2, dtype=jnp.float32), ab12, jnp.asarray(aw3b_wide)]


def _vmem_limit_bytes(TM, obs, H1, H2, S, in_dsize):
    lane = lambda n: _round_up(n, 128)
    sub = lambda n: _round_up(max(n, 1), 8)
    est = 0
    est += 2 * TM * lane(obs) * in_dsize                       # x block (double-buffered)
    est += 2 * TM * lane(OUT_WIDTH) * 4                        # out block
    est += 2 * (sub(obs) * lane(H1) + sub(H1) * lane(H2)) * in_dsize     # fused weights
    est += 2 * 4 * (sub(1) * lane(H1) + sub(1) * lane(H2) + sub(2) * lane(NUM_TEST)
                    + sub(H2) * lane(S) + sub(S) * lane(S) + sub(S) * lane(NUM_TEST)
                    + sub(H2) * lane(NUM_UNITS) + sub(NUM_TEST) * lane(NUM_UNITS)
                    + sub(NUM_UNITS) * lane(NUM_UNITS) + sub(2) * lane(NUM_UNITS)
                    + sub(NUM_UNITS + 1) * lane(OUT_WIDTH))    # small constants
    est += TM * 4 * (lane(H1) + lane(H2) + 4 * lane(S) + 4 * lane(NUM_TEST)
                     + 2 * lane(NUM_UNITS) + lane(OUT_WIDTH))  # live intermediates
    return int(min(64 << 20, max(2 * est, 24 << 20)))


# ----------------------------------------------------------------------------
# Wrapper.
# ----------------------------------------------------------------------------
def actor_attf_forward(s_input, params, row_tile=1024, use_bf16=False):
    """s_input: [n_agents, B, obs_dim]. Returns [n_agents, B, 2] float32."""
    n_good, B, obs = s_input.shape
    if n_good < 2:
        raise ValueError("Actor_attf requires n_agents >= 2 (needs >= 1 neighbor).")
    n_other = n_good - 1
    assert obs == SELF_SIZE + n_other * 4 + FOOD_SIZE, "obs_dim mismatch"
    S = n_other * NUM_TEST
    H1 = (n_other + 2) * NUM_UNITS
    H2 = S + 2 * NUM_TEST

    compute_dtype = jnp.bfloat16 if use_bf16 else jnp.float32
    in_dsize = 2 if use_bf16 else 4
    packed = pack_params(params, n_good, compute_dtype)

    # Fold agents into the batch dimension; no host-side pad (boundary tile is
    # handled by Pallas partial-block masking, rows are independent).
    M = n_good * B
    x = s_input.reshape(M, obs).astype(compute_dtype)

    TM = _round_up(min(row_tile, max(M, 8)), 8)
    if M > 16:                       # ensure >=2 grid steps -> megacore split on v7x
        TM = min(TM, _round_up(pl.cdiv(M, 2), 8))
    grid = (pl.cdiv(M, TM),)

    kernel = make_kernel(n_other, compute_dtype)

    def full_spec(arr):
        nd = arr.ndim
        return pl.BlockSpec(arr.shape, lambda i, _nd=nd: (0,) * _nd)

    in_specs = [pl.BlockSpec((TM, obs), lambda i: (i, 0))]
    in_specs += [full_spec(w) for w in packed]
    out_specs = pl.BlockSpec((TM, OUT_WIDTH), lambda i: (i, 0))

    flops_per_row = 2 * (obs * H1 + H1 * H2 + H2 * S + S * S + S * NUM_TEST
                         + H2 * NUM_UNITS + NUM_TEST * NUM_UNITS
                         + NUM_UNITS * NUM_UNITS + NUM_UNITS * OUT_WIDTH)
    weight_bytes = sum(int(np.prod(p.shape)) * p.dtype.itemsize for p in packed)
    cost = pl.CostEstimate(
        flops=int(M * flops_per_row),
        transcendentals=int(M * (S + 1 + OUT_WIDTH)),           # exp + rsqrt + tanh
        bytes_accessed=int(M * (obs * in_dsize + OUT_WIDTH * 4) + weight_bytes))

    out = pl.pallas_call(
        kernel,
        out_shape=jax.ShapeDtypeStruct((M, OUT_WIDTH), jnp.float32),
        grid=grid,
        in_specs=in_specs,
        out_specs=out_specs,
        compiler_params=pltpu.CompilerParams(
            dimension_semantics=("parallel",),
            vmem_limit_bytes=_vmem_limit_bytes(TM, obs, H1, H2, S, in_dsize)),
        cost_estimate=cost,
    )(x, *packed)

    return out[:, :2].reshape(n_good, B, 2)


# ----------------------------------------------------------------------------
# Deterministic parameter init (PyTorch nn.Linear default: U(-1/sqrt(fan_in), +)).
# Weights stored [in, out]; biases stored [1, out].
# ----------------------------------------------------------------------------
def init_params(key):
    def linear(k, fan_in, fan_out):
        k1, k2 = jax.random.split(k)
        bound = 1.0 / math.sqrt(fan_in)
        W = jax.random.uniform(k1, (fan_in, fan_out), jnp.float32, -bound, bound)
        b = jax.random.uniform(k2, (1, fan_out), jnp.float32, -bound, bound)
        return W, b

    keys = jax.random.split(key, 9)
    en_w1, en_b1 = linear(keys[0], SELF_SIZE, NUM_UNITS)
    en_w2, en_b2 = linear(keys[1], NUM_UNITS, NUM_TEST)
    oa_w1, oa_b1 = linear(keys[2], OTHER_SIZE, NUM_UNITS)
    oa_w2, oa_b2 = linear(keys[3], NUM_UNITS, NUM_TEST)
    ln_g = jnp.ones((1, NUM_TEST), jnp.float32)
    ln_b = jnp.zeros((1, NUM_TEST), jnp.float32)
    g_w1, g_b1 = linear(keys[4], FOOD_SIZE, NUM_UNITS)
    g_w2, g_b2 = linear(keys[5], NUM_UNITS, NUM_TEST)
    a_w1, a_b1 = linear(keys[6], NUM_TEST * 3, NUM_UNITS)
    a_w2, a_b2 = linear(keys[7], NUM_UNITS, NUM_UNITS)
    a_w3, a_b3 = linear(keys[8], NUM_UNITS, 2)
    return [en_w1, en_b1, en_w2, en_b2,
            oa_w1, oa_b1, oa_w2, oa_b2,
            ln_g, ln_b,
            g_w1, g_b1, g_w2, g_b2,
            a_w1, a_b1, a_w2, a_b2, a_w3, a_b3]


# Pure-JAX reference mirroring the PyTorch forward (for correctness check only).
def reference_forward(s_input, params):
    (en_w1, en_b1, en_w2, en_b2, oa_w1, oa_b1, oa_w2, oa_b2,
     ln_g, ln_b, g_w1, g_b1, g_w2, g_b2,
     a_w1, a_b1, a_w2, a_b2, a_w3, a_b3) = params
    n_good, B, obs = s_input.shape
    n_other = n_good - 1
    outs = []
    for i in range(n_good):
        s = s_input[i]
        self_out = jax.nn.relu(jax.nn.relu(s[:, :4] @ en_w1 + en_b1) @ en_w2 + en_b2)
        other_outs = []
        for j in range(n_other):
            t1 = s[:, 4 + j * 2: 6 + j * 2]
            t2 = s[:, 4 + n_other * 2 + j * 2: 4 + n_other * 2 + j * 2 + 2]
            t = jnp.concatenate([t1, t2], axis=1)
            other_outs.append(jax.nn.relu(jax.nn.relu(t @ oa_w1 + oa_b1) @ oa_w2 + oa_b2))
        other = jnp.stack(other_outs, axis=0)                          # [n_other, B, 16]
        scores = jnp.einsum('bd,jbd->bj', self_out, other) / math.sqrt(NUM_TEST)
        attn = jax.nn.softmax(scores, axis=1)
        agg = jnp.einsum('bj,jbd->bd', attn, other)
        mu = agg.mean(axis=1, keepdims=True)
        var = ((agg - mu) ** 2).mean(axis=1, keepdims=True)
        agg = (agg - mu) / jnp.sqrt(var + LN_EPS) * ln_g + ln_b
        agg = jax.nn.relu(agg)
        food = jax.nn.relu(jax.nn.relu(s[:, -2:] @ g_w1 + g_b1) @ g_w2 + g_b2)
        merge = jnp.concatenate([self_out, food, agg], axis=1)
        z = jax.nn.leaky_relu(merge @ a_w1 + a_b1)
        z = jax.nn.leaky_relu(z @ a_w2 + a_b2)
        z = jnp.tanh(z @ a_w3 + a_b3)
        outs.append(z)
    return jnp.stack(outs, axis=0)


if __name__ == "__main__":
    key = jax.random.PRNGKey(0)
    n_agents = 3          # args.n_agents
    batch = 8
    obs_dim = SELF_SIZE + (n_agents - 1) * 4 + FOOD_SIZE   # 4 + 8 + 2 = 14

    kp, kx = jax.random.split(key)
    params = init_params(kp)
    s_input = jax.random.normal(kx, (n_agents, batch, obs_dim), jnp.float32)

    # f32 path (default): strict check against the pure-JAX reference.
    out = jax.block_until_ready(actor_attf_forward(s_input, params))
    ref = jax.block_until_ready(reference_forward(s_input, params))
    np.testing.assert_allclose(np.asarray(out), np.asarray(ref), rtol=1e-4, atol=1e-5)

    # bf16 MXU-operand path (v6e/v7x option): loose sanity check only.
    out_bf = jax.block_until_ready(actor_attf_forward(s_input, params, use_bf16=True))
    assert np.all(np.isfinite(np.asarray(out_bf)))
    np.testing.assert_allclose(np.asarray(out_bf), np.asarray(ref), rtol=0.25, atol=0.1)

    # TODO(synk): logger.add_scalars attention logging has no kernel equivalent (host-side I/O); skipped.
    print("KERNEL_OK")
</pallas_src>

<mosaic_0001>
module attributes {stable_mosaic.version = 11 : i64} {
  func.func @kernel(%arg0: i32, %arg1: memref<16x14xf32, #tpu.memory_space<vmem>>, %arg2: memref<14x128xf32, #tpu.memory_space<vmem>>, %arg3: memref<1x128xf32, #tpu.memory_space<vmem>>, %arg4: memref<128x64xf32, #tpu.memory_space<vmem>>, %arg5: memref<1x64xf32, #tpu.memory_space<vmem>>, %arg6: memref<2x16xf32, #tpu.memory_space<vmem>>, %arg7: memref<64x32xf32, #tpu.memory_space<vmem>>, %arg8: memref<32x32xf32, #tpu.memory_space<vmem>>, %arg9: memref<32x16xf32, #tpu.memory_space<vmem>>, %arg10: memref<64x32xf32, #tpu.memory_space<vmem>>, %arg11: memref<16x32xf32, #tpu.memory_space<vmem>>, %arg12: memref<32x32xf32, #tpu.memory_space<vmem>>, %arg13: memref<2x32xf32, #tpu.memory_space<vmem>>, %arg14: memref<33x128xf32, #tpu.memory_space<vmem>>, %arg15: memref<16x128xf32, #tpu.memory_space<vmem>>) attributes {dimension_semantics = [#tpu.dimension_semantics<parallel>], iteration_bounds = array<i64: 2>, scalar_prefetch = 0 : i64, scratch_operands = 0 : i64, tpu.core_type = #tpu.core_type<tc>, window_params = [{transform_indices = @transform_0, window_bounds = array<i64: 16, 14>}, {pipeline_mode = #tpu.pipeline_mode<synchronous>, transform_indices = @transform_1, window_bounds = array<i64: 14, 128>}, {pipeline_mode = #tpu.pipeline_mode<synchronous>, transform_indices = @transform_2, window_bounds = array<i64: 1, 128>}, {pipeline_mode = #tpu.pipeline_mode<synchronous>, transform_indices = @transform_3, window_bounds = array<i64: 128, 64>}, {pipeline_mode = #tpu.pipeline_mode<synchronous>, transform_indices = @transform_4, window_bounds = array<i64: 1, 64>}, {pipeline_mode = #tpu.pipeline_mode<synchronous>, transform_indices = @transform_5, window_bounds = array<i64: 2, 16>}, {pipeline_mode = #tpu.pipeline_mode<synchronous>, transform_indices = @transform_6, window_bounds = array<i64: 64, 32>}, {pipeline_mode = #tpu.pipeline_mode<synchronous>, transform_indices = @transform_7, window_bounds = array<i64: 32, 32>}, {pipeline_mode = #tpu.pipeline_mode<synchronous>, transform_indices = @transform_8, window_bounds = array<i64: 32, 16>}, {pipeline_mode = #tpu.pipeline_mode<synchronous>, transform_indices = @transform_9, window_bounds = array<i64: 64, 32>}, {pipeline_mode = #tpu.pipeline_mode<synchronous>, transform_indices = @transform_10, window_bounds = array<i64: 16, 32>}, {pipeline_mode = #tpu.pipeline_mode<synchronous>, transform_indices = @transform_11, window_bounds = array<i64: 32, 32>}, {pipeline_mode = #tpu.pipeline_mode<synchronous>, transform_indices = @transform_12, window_bounds = array<i64: 2, 32>}, {pipeline_mode = #tpu.pipeline_mode<synchronous>, transform_indices = @transform_13, window_bounds = array<i64: 33, 128>}, {transform_indices = @transform_14, window_bounds = array<i64: 16, 128>}]} {
    %c0 = arith.constant 0 : index
    %c0_0 = arith.constant 0 : index
    %0 = vector.load %arg1[%c0, %c0_0] : memref<16x14xf32, #tpu.memory_space<vmem>>, vector<16x14xf32>
    %c0_1 = arith.constant 0 : index
    %c0_2 = arith.constant 0 : index
    %1 = vector.load %arg2[%c0_1, %c0_2] : memref<14x128xf32, #tpu.memory_space<vmem>>, vector<14x128xf32>
    %cst = arith.constant dense<0.000000e+00> : vector<16x128xf32>
    %2 = tpu.matmul %0, %1, %cst {dimension_numbers = #tpu.dot_dimension_numbers<[1], [0], [0], [1], [0, 0, 1, 1], [], []>} : vector<16x14xf32>, vector<14x128xf32>, vector<16x128xf32> -> vector<16x128xf32>
    %c0_3 = arith.constant 0 : index
    %c0_4 = arith.constant 0 : index
    %3 = vector.load %arg3[%c0_3, %c0_4] : memref<1x128xf32, #tpu.memory_space<vmem>>, vector<1x128xf32>
    %4 = vector.broadcast %3 : vector<1x128xf32> to vector<16x128xf32>
    %5 = arith.addf %2, %4 : vector<16x128xf32>
    %cst_5 = arith.constant 0.000000e+00 : f32
    %6 = vector.broadcast %cst_5 : f32 to vector<16x128xf32>
    %7 = arith.maximumf %5, %6 : vector<16x128xf32>
    %c0_6 = arith.constant 0 : index
    %c0_7 = arith.constant 0 : index
    %8 = vector.load %arg4[%c0_6, %c0_7] : memref<128x64xf32, #tpu.memory_space<vmem>>, vector<128x64xf32>
    %cst_8 = arith.constant dense<0.000000e+00> : vector<16x64xf32>
    %9 = tpu.matmul %7, %8, %cst_8 {dimension_numbers = #tpu.dot_dimension_numbers<[1], [0], [0], [1], [0, 0, 1, 1], [], []>} : vector<16x128xf32>, vector<128x64xf32>, vector<16x64xf32> -> vector<16x64xf32>
    %c0_9 = arith.constant 0 : index
    %c0_10 = arith.constant 0 : index
    %10 = vector.load %arg5[%c0_9, %c0_10] : memref<1x64xf32, #tpu.memory_space<vmem>>, vector<1x64xf32>
    %11 = vector.broadcast %10 : vector<1x64xf32> to vector<16x64xf32>
    %12 = arith.addf %9, %11 : vector<16x64xf32>
    %cst_11 = arith.constant 0.000000e+00 : f32
    %13 = vector.broadcast %cst_11 : f32 to vector<16x64xf32>
    %14 = arith.maximumf %12, %13 : vector<16x64xf32>
    %c0_12 = arith.constant 0 : index
    %c0_13 = arith.constant 0 : index
    %15 = vector.load %arg7[%c0_12, %c0_13] : memref<64x32xf32, #tpu.memory_space<vmem>>, vector<64x32xf32>
    %cst_14 = arith.constant dense<0.000000e+00> : vector<16x32xf32>
    %16 = tpu.matmul %14, %15, %cst_14 {dimension_numbers = #tpu.dot_dimension_numbers<[1], [0], [0], [1], [0, 0, 1, 1], [], []>} : vector<16x64xf32>, vector<64x32xf32>, vector<16x32xf32> -> vector<16x32xf32>
    %17 = vector.extract_strided_slice %14 {offsets = [0, 0], sizes = [16, 32], strides = [1, 1]} : vector<16x64xf32> to vector<16x32xf32>
    %18 = arith.mulf %16, %17 : vector<16x32xf32>
    %c0_15 = arith.constant 0 : index
    %c0_16 = arith.constant 0 : index
    %19 = vector.load %arg8[%c0_15, %c0_16] : memref<32x32xf32, #tpu.memory_space<vmem>>, vector<32x32xf32>
    %cst_17 = arith.constant dense<0.000000e+00> : vector<16x32xf32>
    %20 = tpu.matmul %18, %19, %cst_17 {dimension_numbers = #tpu.dot_dimension_numbers<[1], [0], [0], [1], [0, 0, 1, 1], [], []>} : vector<16x32xf32>, vector<32x32xf32>, vector<16x32xf32> -> vector<16x32xf32>
    %cst_18 = arith.constant 2.500000e-01 : f32
    %21 = vector.broadcast %cst_18 : f32 to vector<16x32xf32>
    %22 = arith.mulf %20, %21 : vector<16x32xf32>
    %cst_19 = arith.constant dense<0xFF800000> : vector<16xf32>
    %23 = vector.multi_reduction <maximumf>, %22, %cst_19 [1] : vector<16x32xf32> to vector<16xf32>
    %24 = vector.shape_cast %23 : vector<16xf32> to vector<16x1xf32>
    %25 = vector.broadcast %24 : vector<16x1xf32> to vector<16x32xf32>
    %26 = arith.subf %22, %25 : vector<16x32xf32>
    %27 = math.exp %26 : vector<16x32xf32>
    %cst_20 = arith.constant dense<0.000000e+00> : vector<16xf32>
    %28 = vector.multi_reduction <add>, %27, %cst_20 [1] : vector<16x32xf32> to vector<16xf32>
    %29 = vector.shape_cast %28 : vector<16xf32> to vector<16x1xf32>
    %cst_21 = arith.constant 1.600000e+01 : f32
    %30 = vector.broadcast %cst_21 : f32 to vector<16x1xf32>
    %31 = arith.divf %30, %29 : vector<16x1xf32>
    %32 = vector.broadcast %31 : vector<16x1xf32> to vector<16x32xf32>
    %33 = arith.mulf %27, %32 : vector<16x32xf32>
    %34 = arith.mulf %33, %17 : vector<16x32xf32>
    %c0_22 = arith.constant 0 : index
    %c0_23 = arith.constant 0 : index
    %35 = vector.load %arg9[%c0_22, %c0_23] : memref<32x16xf32, #tpu.memory_space<vmem>>, vector<32x16xf32>
    %cst_24 = arith.constant dense<0.000000e+00> : vector<16x16xf32>
    %36 = tpu.matmul %34, %35, %cst_24 {dimension_numbers = #tpu.dot_dimension_numbers<[1], [0], [0], [1], [0, 0, 1, 1], [], []>} : vector<16x32xf32>, vector<32x16xf32>, vector<16x16xf32> -> vector<16x16xf32>
    %cst_25 = arith.constant dense<0.000000e+00> : vector<16xf32>
    %37 = vector.multi_reduction <add>, %36, %cst_25 [1] : vector<16x16xf32> to vector<16xf32>
    %38 = vector.shape_cast %37 : vector<16xf32> to vector<16x1xf32>
    %cst_26 = arith.constant 1.600000e+01 : f32
    %39 = vector.broadcast %cst_26 : f32 to vector<16x1xf32>
    %40 = arith.divf %38, %39 : vector<16x1xf32>
    %41 = vector.broadcast %40 : vector<16x1xf32> to vector<16x16xf32>
    %42 = arith.subf %36, %41 : vector<16x16xf32>
    %43 = arith.mulf %42, %42 : vector<16x16xf32>
    %cst_27 = arith.constant dense<0.000000e+00> : vector<16xf32>
    %44 = vector.multi_reduction <add>, %43, %cst_27 [1] : vector<16x16xf32> to vector<16xf32>
    %45 = vector.shape_cast %44 : vector<16xf32> to vector<16x1xf32>
    %cst_28 = arith.constant 1.600000e+01 : f32
    %46 = vector.broadcast %cst_28 : f32 to vector<16x1xf32>
    %47 = arith.divf %45, %46 : vector<16x1xf32>
    %48 = vector.broadcast %40 : vector<16x1xf32> to vector<16x16xf32>
    %49 = arith.subf %36, %48 : vector<16x16xf32>
    %cst_29 = arith.constant 9.99999974E-6 : f32
    %50 = vector.broadcast %cst_29 : f32 to vector<16x1xf32>
    %51 = arith.addf %47, %50 : vector<16x1xf32>
    %52 = math.rsqrt %51 : vector<16x1xf32>
    %53 = vector.broadcast %52 : vector<16x1xf32> to vector<16x16xf32>
    %54 = arith.mulf %49, %53 : vector<16x16xf32>
    %c0_30 = arith.constant 0 : index
    %c0_31 = arith.constant 0 : index
    %55 = vector.load %arg6[%c0_30, %c0_31] : memref<2x16xf32, #tpu.memory_space<vmem>>, vector<2x16xf32>
    %56 = vector.extract_strided_slice %55 {offsets = [0, 0], sizes = [1, 16], strides = [1, 1]} : vector<2x16xf32> to vector<1x16xf32>
    %57 = vector.broadcast %56 : vector<1x16xf32> to vector<16x16xf32>
    %58 = arith.mulf %54, %57 : vector<16x16xf32>
    %59 = vector.extract_strided_slice %55 {offsets = [1, 0], sizes = [1, 16], strides = [1, 1]} : vector<2x16xf32> to vector<1x16xf32>
    %60 = vector.broadcast %59 : vector<1x16xf32> to vector<16x16xf32>
    %61 = arith.addf %58, %60 : vector<16x16xf32>
    %cst_32 = arith.constant 0.000000e+00 : f32
    %62 = vector.broadcast %cst_32 : f32 to vector<16x16xf32>
    %63 = arith.maximumf %61, %62 : vector<16x16xf32>
    %c0_33 = arith.constant 0 : index
    %c0_34 = arith.constant 0 : index
    %64 = vector.load %arg13[%c0_33, %c0_34] : memref<2x32xf32, #tpu.memory_space<vmem>>, vector<2x32xf32>
    %c0_35 = arith.constant 0 : index
    %c0_36 = arith.constant 0 : index
    %65 = vector.load %arg10[%c0_35, %c0_36] : memref<64x32xf32, #tpu.memory_space<vmem>>, vector<64x32xf32>
    %cst_37 = arith.constant dense<0.000000e+00> : vector<16x32xf32>
    %66 = tpu.matmul %14, %65, %cst_37 {dimension_numbers = #tpu.dot_dimension_numbers<[1], [0], [0], [1], [0, 0, 1, 1], [], []>} : vector<16x64xf32>, vector<64x32xf32>, vector<16x32xf32> -> vector<16x32xf32>
    %c0_38 = arith.constant 0 : index
    %c0_39 = arith.constant 0 : index
    %67 = vector.load %arg11[%c0_38, %c0_39] : memref<16x32xf32, #tpu.memory_space<vmem>>, vector<16x32xf32>
    %cst_40 = arith.constant dense<0.000000e+00> : vector<16x32xf32>
    %68 = tpu.matmul %63, %67, %cst_40 {dimension_numbers = #tpu.dot_dimension_numbers<[1], [0], [0], [1], [0, 0, 1, 1], [], []>} : vector<16x16xf32>, vector<16x32xf32>, vector<16x32xf32> -> vector<16x32xf32>
    %69 = arith.addf %66, %68 : vector<16x32xf32>
    %70 = vector.extract_strided_slice %64 {offsets = [0, 0], sizes = [1, 32], strides = [1, 1]} : vector<2x32xf32> to vector<1x32xf32>
    %71 = vector.broadcast %70 : vector<1x32xf32> to vector<16x32xf32>
    %72 = arith.addf %69, %71 : vector<16x32xf32>
    %cst_41 = arith.constant 0.000000e+00 : f32
    %73 = vector.broadcast %cst_41 : f32 to vector<16x32xf32>
    %74 = arith.cmpf ogt, %72, %73 : vector<16x32xf32>
    %cst_42 = arith.constant 0.00999999977 : f32
    %75 = vector.broadcast %cst_42 : f32 to vector<16x32xf32>
    %76 = arith.mulf %75, %72 : vector<16x32xf32>
    %77 = arith.select %74, %72, %76 : vector<16x32xi1>, vector<16x32xf32>
    %c0_43 = arith.constant 0 : index
    %c0_44 = arith.constant 0 : index
    %78 = vector.load %arg12[%c0_43, %c0_44] : memref<32x32xf32, #tpu.memory_space<vmem>>, vector<32x32xf32>
    %cst_45 = arith.constant dense<0.000000e+00> : vector<16x32xf32>
    %79 = tpu.matmul %77, %78, %cst_45 {dimension_numbers = #tpu.dot_dimension_numbers<[1], [0], [0], [1], [0, 0, 1, 1], [], []>} : vector<16x32xf32>, vector<32x32xf32>, vector<16x32xf32> -> vector<16x32xf32>
    %80 = vector.extract_strided_slice %64 {offsets = [1, 0], sizes = [1, 32], strides = [1, 1]} : vector<2x32xf32> to vector<1x32xf32>
    %81 = vector.broadcast %80 : vector<1x32xf32> to vector<16x32xf32>
    %82 = arith.addf %79, %81 : vector<16x32xf32>
    %cst_46 = arith.constant 0.000000e+00 : f32
    %83 = vector.broadcast %cst_46 : f32 to vector<16x32xf32>
    %84 = arith.cmpf ogt, %82, %83 : vector<16x32xf32>
    %cst_47 = arith.constant 0.00999999977 : f32
    %85 = vector.broadcast %cst_47 : f32 to vector<16x32xf32>
    %86 = arith.mulf %85, %82 : vector<16x32xf32>
    %87 = arith.select %84, %82, %86 : vector<16x32xi1>, vector<16x32xf32>
    %c0_48 = arith.constant 0 : index
    %c0_49 = arith.constant 0 : index
    %88 = vector.load %arg14[%c0_48, %c0_49] : memref<33x128xf32, #tpu.memory_space<vmem>>, vector<33x128xf32>
    %89 = vector.extract_strided_slice %88 {offsets = [0, 0], sizes = [32, 128], strides = [1, 1]} : vector<33x128xf32> to vector<32x128xf32>
    %cst_50 = arith.constant dense<0.000000e+00> : vector<16x128xf32>
    %90 = tpu.matmul %87, %89, %cst_50 {dimension_numbers = #tpu.dot_dimension_numbers<[1], [0], [0], [1], [0, 0, 1, 1], [], []>} : vector<16x32xf32>, vector<32x128xf32>, vector<16x128xf32> -> vector<16x128xf32>
    %91 = vector.extract_strided_slice %88 {offsets = [32, 0], sizes = [1, 128], strides = [1, 1]} : vector<33x128xf32> to vector<1x128xf32>
    %92 = vector.broadcast %91 : vector<1x128xf32> to vector<16x128xf32>
    %93 = arith.addf %90, %92 : vector<16x128xf32>
    %94 = math.tanh %93 : vector<16x128xf32>
    %c0_51 = arith.constant 0 : index
    %c0_52 = arith.constant 0 : index
    %95 = vector.load %arg15[%c0_51, %c0_52] : memref<16x128xf32, #tpu.memory_space<vmem>>, vector<16x128xf32>
    tpu.vector_store %arg15[%c0_51, %c0_52], %94 {strides = array<i32>} : memref<16x128xf32, #tpu.memory_space<vmem>>, vector<16x128xf32>,
    return
  }
  func.func @transform_0(%arg0: i32) -> (i32, i32) {
    %c0_i32 = arith.constant 0 : i32
    %c0_i32_0 = arith.constant 0 : i32
    return %arg0, %c0_i32 : i32, i32
  }
  func.func @transform_1(%arg0: i32) -> (i32, i32) {
    %c0_i32 = arith.constant 0 : i32
    %c0_i32_0 = arith.constant 0 : i32
    %c0_i32_1 = arith.constant 0 : i32
    return %c0_i32, %c0_i32_0 : i32, i32
  }
  func.func @transform_2(%arg0: i32) -> (i32, i32) {
    %c0_i32 = arith.constant 0 : i32
    %c0_i32_0 = arith.constant 0 : i32
    %c0_i32_1 = arith.constant 0 : i32
    return %c0_i32, %c0_i32_0 : i32, i32
  }
  func.func @transform_3(%arg0: i32) -> (i32, i32) {
    %c0_i32 = arith.constant 0 : i32
    %c0_i32_0 = arith.constant 0 : i32
    %c0_i32_1 = arith.constant 0 : i32
    return %c0_i32, %c0_i32_0 : i32, i32
  }
  func.func @transform_4(%arg0: i32) -> (i32, i32) {
    %c0_i32 = arith.constant 0 : i32
    %c0_i32_0 = arith.constant 0 : i32
    %c0_i32_1 = arith.constant 0 : i32
    return %c0_i32, %c0_i32_0 : i32, i32
  }
  func.func @transform_5(%arg0: i32) -> (i32, i32) {
    %c0_i32 = arith.constant 0 : i32
    %c0_i32_0 = arith.constant 0 : i32
    %c0_i32_1 = arith.constant 0 : i32
    return %c0_i32, %c0_i32_0 : i32, i32
  }
  func.func @transform_6(%arg0: i32) -> (i32, i32) {
    %c0_i32 = arith.constant 0 : i32
    %c0_i32_0 = arith.constant 0 : i32
    %c0_i32_1 = arith.constant 0 : i32
    return %c0_i32, %c0_i32_0 : i32, i32
  }
  func.func @transform_7(%arg0: i32) -> (i32, i32) {
    %c0_i32 = arith.constant 0 : i32
    %c0_i32_0 = arith.constant 0 : i32
    %c0_i32_1 = arith.constant 0 : i32
    return %c0_i32, %c0_i32_0 : i32, i32
  }
  func.func @transform_8(%arg0: i32) -> (i32, i32) {
    %c0_i32 = arith.constant 0 : i32
    %c0_i32_0 = arith.constant 0 : i32
    %c0_i32_1 = arith.constant 0 : i32
    return %c0_i32, %c0_i32_0 : i32, i32
  }
  func.func @transform_9(%arg0: i32) -> (i32, i32) {
    %c0_i32 = arith.constant 0 : i32
    %c0_i32_0 = arith.constant 0 : i32
    %c0_i32_1 = arith.constant 0 : i32
    return %c0_i32, %c0_i32_0 : i32, i32
  }
  func.func @transform_10(%arg0: i32) -> (i32, i32) {
    %c0_i32 = arith.constant 0 : i32
    %c0_i32_0 = arith.constant 0 : i32
    %c0_i32_1 = arith.constant 0 : i32
    return %c0_i32, %c0_i32_0 : i32, i32
  }
  func.func @transform_11(%arg0: i32) -> (i32, i32) {
    %c0_i32 = arith.constant 0 : i32
    %c0_i32_0 = arith.constant 0 : i32
    %c0_i32_1 = arith.constant 0 : i32
    return %c0_i32, %c0_i32_0 : i32, i32
  }
  func.func @transform_12(%arg0: i32) -> (i32, i32) {
    %c0_i32 = arith.constant 0 : i32
    %c0_i32_0 = arith.constant 0 : i32
    %c0_i32_1 = arith.constant 0 : i32
    return %c0_i32, %c0_i32_0 : i32, i32
  }
  func.func @transform_13(%arg0: i32) -> (i32, i32) {
    %c0_i32 = arith.constant 0 : i32
    %c0_i32_0 = arith.constant 0 : i32
    %c0_i32_1 = arith.constant 0 : i32
    return %c0_i32, %c0_i32_0 : i32, i32
  }
  func.func @transform_14(%arg0: i32) -> (i32, i32) {
    %c0_i32 = arith.constant 0 : i32
    %c0_i32_0 = arith.constant 0 : i32
    return %arg0, %c0_i32 : i32, i32
  }
}

</mosaic_0001>

<bundles_post_ra>
// kernel: tpu_custom_call.1
= control target key start
LH: loop header
LB: loop body
LE: loop exit
PB: predicated region body
PF: predicated region fallthrough
CT: control target
= control target key end

     0   :  { %s2352_s0 = inlined_call_operand.vmem [shape: f32[24,14], index: 0, kind: input, shape index: {}]   ;;  %s2353_s1 = inlined_call_operand.vmem [shape: f32[14,128], index: 1, kind: input, shape index: {}]   ;;  %s2354_s2 = inlined_call_operand.vmem [shape: f32[1,128], index: 2, kind: input, shape index: {}]   ;;  %s2355_s3 = inlined_call_operand.vmem [shape: f32[128,64], index: 3, kind: input, shape index: {}]   ;;  %s2356_s4 = inlined_call_operand.vmem [shape: f32[1,64], index: 4, kind: input, shape index: {}]   ;;  %s2357_s5 = inlined_call_operand.vmem [shape: f32[2,16], index: 5, kind: input, shape index: {}]   ;;  %s2358_s6 = inlined_call_operand.vmem [shape: f32[64,32], index: 6, kind: input, shape index: {}]   ;;  %s2359_s7 = inlined_call_operand.vmem [shape: f32[32,32], index: 7, kind: input, shape index: {}]   ;;  %s2360_s8 = inlined_call_operand.vmem [shape: f32[32,16], index: 8, kind: input, shape index: {}]   ;;  %s2361_s9 = inlined_call_operand.vmem [shape: f32[64,32], index: 9, kind: input, shape index: {}]   ;;  %s2362_s10 = inlined_call_operand.vmem [shape: f32[16,32], index: 10, kind: input, shape index: {}]   ;;  %s2363_s11 = inlined_call_operand.vmem [shape: f32[32,32], index: 11, kind: input, shape index: {}]   ;;  %s2364_s12 = inlined_call_operand.vmem [shape: f32[2,32], index: 12, kind: input, shape index: {}]   ;;  %s2365_s13 = inlined_call_operand.vmem [shape: f32[33,128], index: 13, kind: input, shape index: {}]   ;;  %s2366_s14 = inlined_call_operand.hbm [shape: f32[24,128], index: 14, kind: output, shape index: {}]  }
   0x1   :  { %2371 = sst [smem:[#allocation9_spill]] %s2353_s1 }
   0x2   :  { %19 = vsyncpa [#allocation3], 0 }
   0x3   :  { %21 = vsyncpa [#allocation3 + $0x1], 0  ;;  %s2022_s29 = smov 0   ;;  %s2024_s30 = smov 0  }
   0x4   :  { %s2026_s15 = smov 0   ;;  %s2028_s16 = smov 0  }
   0x5 LB: > { %2372 = sst [smem:[#allocation5_spill]] %s1937_s15  ;;  %s2043_s17 = sadd.s32 4294967295, %s1941_s16   ;;  %s1941_s16 = sphi %s2028_s16, %s2380_s16   ;;  %s1937_s15 = sphi %s2026_s15, %s2382_s15   ;;  %s1933_s30 = sphi %s2024_s30, %s2384_s30   ;;  %s1929_s29 = sphi %s2022_s29, %s2383_s29  }
   0x6   : > { %s1476_s18 = sadd.s32 4294967294, %s1941_s16   ;;  %s2047_s19 = sadd.s32 1, %s1941_s16  }
   0x7   : > { %2373 = sst [smem:[#allocation6_spill]] %s2047_s19  ;;  %s333_s20 = sadd.s32 1, %s1937_s15 }
   0x8   : > { %s330_s21 = ssub.s32 %s1941_s16, %s2047_s19  ;;  %p343_p0 = scmp.ne.s32.totalorder %s1937_s15, %s1933_s30 }
   0x9   : > { %p331_p1 = scmp.eq.s32.totalorder %s330_s21, 0  ;;  %p344_p2 = scmp.eq.s32.totalorder %s2043_s17, 1 }
   0xa   : > { %p349_p3 = scmp.ne.s32.totalorder %s1933_s30, %s1929_s29  ;;  %p350_p4 = scmp.eq.s32.totalorder %s1476_s18, 1 }
   0xb   : > { %s2058_s22 = scalar_select %p331_p1, %s1937_s15, %s333_s20  }
   0xc   : > { %p2060_p5 = por %p344_p2, %p343_p0  ;;  %p2064_p6 = por %p350_p4, %p349_p3 }
   0xd   : > { %2374 = sst [smem:[#allocation7_spill]] %s2058_s22  ;;  %p1479_p7 = scmp.ge.s32.totalorder %s1941_s16, 1 }
   0xe   : > { %s2376_s24 = scalar_select %p2064_p6, 1, 0 }
   0xf   : > { %p424_p8 = scmp.lt.s32.totalorder %s1941_s16, 3 }
  0x10   : > { %2377 = sst [smem:[#allocation8_spill]] %s2376_s24 }
  0x11   : > { %p425_p9 = pnand %p1479_p7, %p424_p8 }
  0x12   : > { %s2378_s1 = sld [smem:[#allocation9_spill]] (!%p425_p9)  ;;  %vm511_vm0 = vcmask (!%p425_p9), 1045504   ;;  %s2077_s18 = sshll.u32 (!%p425_p9), %s2043_s17, 1  ;;  %vm1943_vm1 = vmmov (!%p425_p9), 1   ;;  %v592_v3 = vld [vmem:[%s2355_s3] sm:$0xff] (!%p425_p9)  ;;  %v593_v4 = vld [vmem:[%s2355_s3 + $0x8] sm:$0xff] (!%p425_p9) }
  0x13   : > { %428 = sbr.rel (%p425_p9) target bundleno = 2459 (0x99b), region = 76  ;;  %vm1715_vm2 = vmpackc.low (!%p425_p9), %vm511_vm0, %vm1943_vm1  ;;  %p479_p10 = scmp.lt.s32.totalorder (!%p425_p9), %s2077_s18, 2  ;;  %v1720_v5 = vpack.c.bf16 (!%p425_p9), %v593_v4, %v592_v3  ;;  %v594_v6 = vld [vmem:[%s2355_s3 + $0x10] sm:$0xff] (!%p425_p9)  ;;  %v595_v7 = vld [vmem:[%s2355_s3 + $0x18] sm:$0xff] (!%p425_p9)  ;;  %vm504_vm3 = vcmask (!%p425_p9), 113664   ;;  %vm700_vm4 = vcmask (!%p425_p9), 523264  }
  0x14   : > { %v1724_v8 = vpack.c.bf16 (!%p425_p9), %v595_v7, %v594_v6  ;;  %v596_v9 = vld [vmem:[%s2355_s3 + $0x20] sm:$0xff] (!%p425_p9)  ;;  %v597_v10 = vld [vmem:[%s2355_s3 + $0x28] sm:$0xff] (!%p425_p9)  ;;  %v598_v12 = vld [vmem:[%s2355_s3 + $0x30] sm:$0xff] (!%p425_p9)  ;;  %vm788_vm5 = vcmask (!%p425_p9), 261120   ;;  %vm983_vm6 = vcmask (!%p425_p9), 130048   ;;  %s471_s26 = sand.u32 (!%p425_p9), 1, %s1933_s30  }
  0x15   : > { %1721 = vmatprep.subr.bf16.mxu1 (!%p425_p9), %v1720_v5  ;;  %v1728_v11 = vpack.c.bf16 (!%p425_p9), %v597_v10, %v596_v9  ;;  %v599_v15 = vld [vmem:[%s2355_s3 + $0x38] sm:$0xff] (!%p425_p9)  ;;  %v600_v17 = vld [vmem:[%s2355_s3 + $0x40] sm:$0xff] (!%p425_p9)  ;;  %v601_v18 = vld [vmem:[%s2355_s3 + $0x48] sm:$0xff] (!%p425_p9)  ;;  %s1480_s22 = sshll.u32 (!%p425_p9), %s471_s26, 4  ;;  %s2292_s19 = scalar_lea.sflag (!%p425_p9), [#allocation3], %s471_s26 }
  0x16   : > { %1723 = vmatpush3.bf16.msra.mxu1 (!%p425_p9), %v1720_v5  ;;  %v1732_v16 = vpack.c.bf16 (!%p425_p9), %v599_v15, %v598_v12  ;;  %v1736_v19 = vpack.c.bf16 (!%p425_p9), %v601_v18, %v600_v17  ;;  %v602_v20 = vld [vmem:[%s2355_s3 + $0x50] sm:$0xff] (!%p425_p9)  ;;  %v603_v21 = vld [vmem:[%s2355_s3 + $0x58] sm:$0xff] (!%p425_p9)  ;;  %v604_v23 = vld [vmem:[%s2355_s3 + $0x60] sm:$0xff] (!%p425_p9)  ;;  %s473_s28 = scalar_lea.vmem (!%p425_p9), [#allocation2], %s1480_s22 }
  0x17   : > { %1725 = vmatprep.subr.bf16.mxu1 (!%p425_p9), %v1724_v8  ;;  %v1740_v22 = vpack.c.bf16 (!%p425_p9), %v603_v21, %v602_v20  ;;  %v605_v24 = vld [vmem:[%s2355_s3 + $0x68] sm:$0xff] (!%p425_p9)  ;;  %v606_v26 = vld [vmem:[%s2355_s3 + $0x70] sm:$0xff] (!%p425_p9)  ;;  %v607_v27 = vld [vmem:[%s2355_s3 + $0x78] sm:$0xff] (!%p425_p9) }
  0x18   : > { %v495_v0 = vld [vmem:[%s2378_s1] sm:$0xff] (!%p425_p9)  ;;  %v496_v1 = vld [vmem:[%s2378_s1 + $0x8] sm:$0x3f] (!%p425_p9)  ;;  %v1744_v25 = vpack.c.bf16 (!%p425_p9), %v605_v24, %v604_v23  ;;  %v1748_v28 = vpack.c.bf16 (!%p425_p9), %v607_v27, %v606_v26  ;;  %v694_v31 = vld [vmem:[%s2358_s6 + $0x10] sm:$0xff] (!%p425_p9) }
  0x19   : > { %v1714_v2 = vpack.c.bf16 (!%p425_p9), %v496_v1, %v495_v0  ;;  %v692_v29 = vld [vmem:[%s2358_s6] sm:$0xff] (!%p425_p9)  ;;  %v693_v30 = vld [vmem:[%s2358_s6 + $0x8] sm:$0xff] (!%p425_p9)  ;;  %v695_v33 = vld [vmem:[%s2358_s6 + $0x18] sm:$0xff] (!%p425_p9) }
  0x1a   : > { %s480_s15 = scalar_select %p479_p10, %s2077_s18, 2  ;;  %1727 = vmatpush3.bf16.msra.mxu1 %v1724_v8  ;;  %v1752_v32 = vpack.c.bf16 %v693_v30, %v692_v29  ;;  %v1756_v34 = vpack.c.bf16 %v695_v33, %v694_v31  ;;  %v696_v35 = vld [vmem:[%s2358_s6 + $0x20] sm:$0xff]  ;;  %v697_v36 = vld [vmem:[%s2358_s6 + $0x28] sm:$0xff]  ;;  %v698_v45 = vld [vmem:[%s2358_s6 + $0x30] sm:$0xff] }
  0x1b   : > { %1716 = vmatprep.subr.msk.bf16.mxu0 %vm1715_vm2, %v1714_v2  ;;  %1729 = vmatprep.subr.bf16.mxu1 %v1728_v11  ;;  %v1760_v37 = vpack.c.bf16 %v697_v36, %v696_v35  ;;  %v1483_v38 = vld [vmem:[%s2354_s2] ss:$0 sm:$0xff]  ;;  %v699_v46 = vld [vmem:[%s2358_s6 + $0x38] sm:$0xff]  ;;  %v785_v49 = vld [vmem:[%s2359_s7 + $0x8] sm:$0xff]  ;;  %s1403_s24 = ssub.s32 (%p2060_p5), 3, %s2077_s18 }
  0x1c   : > { %1719 = vmatpush3.bf16.msk.msra.mxu0 %vm1715_vm2, %v1714_v2  ;;  %s1482_s25 = sshll.u32 %s480_s15, 3  ;;  %v1764_v47 = vpack.c.bf16 %v699_v46, %v698_v45  ;;  %v784_v48 = vld [vmem:[%s2359_s7] sm:$0xff]  ;;  %v786_v58 = vld [vmem:[%s2359_s7 + $0x10] sm:$0xff]  ;;  %v787_v59 = vld [vmem:[%s2359_s7 + $0x18] sm:$0xff]  ;;  %p1404_p11 = scmp.lt.s32.totalorder (%p2060_p5), %s1403_s24, 2 }
  0x1d   : > { %s482_s1 = scalar_lea.vmem %s2352_s0, %s1482_s25  ;;  %1753 = vmatprep.subr.bf16.mxu0 %v1752_v32  ;;  %v1768_v50 = vpack.c.bf16 %v785_v49, %v784_v48  ;;  %v1487_v51 = vld [vmem:[%s2356_s4] ss:$0 sm:$0xff]  ;;  %v1772_v60 = vpack.c.bf16 %v787_v59, %v786_v58  ;;  %v899_v18 = vld [vmem:[%s2360_s8 + $0x8] sm:$0xff]  ;;  %v900_v20 = vld [vmem:[%s2360_s8 + $0x10] sm:$0xff]  ;;  %v1012_v59 = vlaneseq }
  0x1e   : > { %v493_v13 = vld [vmem:[%s482_s1] sm:$0xff]  ;;  %v494_v14 = vld [vmem:[%s482_s1 + $0x8] sm:$0xff]  ;;  %1731 = vmatpush3.bf16.msra.mxu1 %v1728_v11  ;;  %v901_v21 = vld [vmem:[%s2360_s8 + $0x18] sm:$0xff] }
  0x1f   : > { %1587 = vmatprep.mubr.msk.f32.mxu0 %vm504_vm3, %v493_v13  ;;  %1733 = vmatprep.subr.bf16.mxu1 %v1732_v16  ;;  %v898_v17 = vld [vmem:[%s2360_s8] sm:$0xff]  ;;  %v1036_v48 = vld [vmem:[%s2362_s10 + $0x8] sm:$0xff] }
  0x20   : > { %1588 = vmatmul.mubr.msk.f32.vlgmr.msra.gmra.mrb[0].mxu0 %vm504_vm3, %v494_v14 }
  0x21   : > { %1755 = vmatpush3.bf16.msra.mxu0 %v1752_v32 }
  0x22   : > { %1735 = vmatpush3.bf16.msra.mxu1 %v1732_v16  ;;  %1757 = vmatprep.subr.bf16.mxu0 %v1756_v34 }
  0x23   : > { %1737 = vmatprep.subr.bf16.mxu1 %v1736_v19 }
  0x25   : > { %1759 = vmatpush3.bf16.msra.mxu0 %v1756_v34 }
  0x26   : > { %1739 = vmatpush3.bf16.msra.mxu1 %v1736_v19  ;;  %1761 = vmatprep.subr.bf16.mxu0 %v1760_v37  ;;  %v1776_v19 = vpack.c.bf16 %v899_v18, %v898_v17  ;;  %v1031_v17 = vld [vmem:[%s2361_s9 + $0x20] sm:$0xff]  ;;  %v1032_v18 = vld [vmem:[%s2361_s9 + $0x28] sm:$0xff] }
  0x27   : > { %1741 = vmatprep.subr.bf16.mxu1 %v1740_v22 }
  0x29   : > { %1763 = vmatpush3.bf16.msra.mxu0 %v1760_v37 }
  0x2a   : > { %1743 = vmatpush3.bf16.msra.mxu1 %v1740_v22  ;;  %1765 = vmatprep.subr.bf16.mxu0 %v1764_v47  ;;  %v1780_v22 = vpack.c.bf16 %v901_v21, %v900_v20  ;;  %v1033_v20 = vld [vmem:[%s2361_s9 + $0x30] sm:$0xff]  ;;  %v1034_v21 = vld [vmem:[%s2361_s9 + $0x38] sm:$0xff] }
  0x2b   : > { %1745 = vmatprep.subr.bf16.mxu1 %v1744_v25 }
  0x2d   : > { %1767 = vmatpush3.bf16.msra.mxu0 %v1764_v47  ;;  %v1035_v47 = vld [vmem:[%s2362_s10] sm:$0xff] }
  0x2e   : > { %1747 = vmatpush3.bf16.msra.mxu1 %v1744_v25  ;;  %1769 = vmatprep.subr.bf16.mxu0 %v1768_v50  ;;  %v1784_v49 = vpack.c.bf16 %v1036_v48, %v1035_v47 }
  0x2f   : > { %1749 = vmatprep.subr.bf16.mxu1 %v1748_v28 }
  0x32   : > { %1751 = vmatpush3.bf16.msra.mxu1 %v1748_v28 }
  0x33   : > { %1785 = vmatprep.subr.bf16.mxu1 %v1784_v49 }
  0xf3   : > { %v1589_v39 = vpop.f32.mrb[0].mxu0 }
  0xf4   : > { %v587_v40 = vadd.f32 %v1589_v39, %v1483_v38  ;;  %v581_v41 = vpop.f32.mrb[1].mxu0 }
  0xf5   : > { %v582_v42 = vadd.f32 %v1483_v38, %v581_v41 }
  0xf6   : > { %v591_v44 = vmax.f32 %v587_v40, 0.0 }
  0xf7   : > { %v590_v43 = vmax.f32 %v582_v42, 0.0 }
  0xf9   : > { %1622 = vmatprep.mubr.f32.mxu1 %v590_v43 }
  0xfa   : > { %1623 = vmatmul.mubr.f32.vlgmr.msra.gmra.mrb[0].mxu1 %v591_v44 }
  0xfb   : > { %1787 = vmatpush3.bf16.msra.mxu1 %v1784_v49 }
 0x1cd   : > { %v1624_v52 = vpop.f32.mrb[0].mxu1 }
 0x1ce   : > { %v687_v53 = vadd.f32 %v1624_v52, %v1487_v51  ;;  %v681_v54 = vpop.f32.mrb[1].mxu1 }
 0x1cf   : > { %v682_v55 = vadd.f32 %v1487_v51, %v681_v54  ;;  %v1028_v51 = vld [vmem:[%s2361_s9 + $0x8] sm:$0xff] }
 0x1d0   : > { %v2170_v57 = vmax.f32 %v687_v53, 0.0 }
 0x1d1   : > { %v2168_v56 = vmax.f32 %v682_v55, 0.0 }
 0x1d3   : > { %1641 = vmatprep.mubr.msk.f32.mxu0 %vm700_vm4, %v2168_v56 }
 0x1d4   : > { %1642 = vmatmul.mubr.msk.f32.vlgmr.msra.gmra.mrb[2].mxu0 %vm700_vm4, %v2170_v57 }
 0x1d5   : > { %1771 = vmatpush3.bf16.msra.mxu0 %v1768_v50  ;;  %v1027_v50 = vld [vmem:[%s2361_s9] sm:$0xff] }
 0x1d6   : > { %1773 = vmatprep.subr.bf16.mxu0 %v1772_v60  ;;  %v1788_v52 = vpack.c.bf16 %v1028_v51, %v1027_v50 }
 0x1d8   : > { %1789 = vmatprep.subr.bf16.mxu1 %v1788_v52 }
 0x1d9   : > { %1775 = vmatpush3.bf16.msra.mxu0 %v1772_v60 }
 0x1da   : > { %1777 = vmatprep.subr.bf16.mxu0 %v1776_v19 }
 0x2a7   : > { %v1643_v61 = vpop.f32.mrb[2].mxu0 }
 0x2a8   : > { %v773_v62 = vpop.f32.mrb[3].mxu0  ;;  %v783_v0 = vmul.f32 %v1643_v61, %v2170_v57 }
 0x2a9   : > { %v782_v63 = vmul.f32 %v773_v62, %v2168_v56  ;;  %v2222_v62 = vshrl.u32 %v1012_v59, 7 }
 0x2ab   : > { %1652 = vmatprep.mubr.msk.f32.mxu0 %vm788_vm5, %v782_v63  ;;  %v1014_v63 = vsub.s32 0, %v2222_v62 }
 0x2ac   : > { %1653 = vmatmul.mubr.msk.f32.vlgmr.msra.gmra.mrb[4].mxu0 %vm788_vm5, %v783_v0  ;;  %v1011_v0 = vld [vmem:[%s2357_s5] sm:$0x3] }
 0x2ad   : > { %1779 = vmatpush3.bf16.msra.mxu0 %v1776_v19  ;;  %v1796_v19 = vpack.c.bf16 %v1032_v18, %v1031_v17 }
 0x2ae   : > { %1781 = vmatprep.subr.bf16.mxu0 %v1780_v22 }
 0x2b1   : > { %1783 = vmatpush3.bf16.msra.mxu0 %v1780_v22  ;;  %v1800_v22 = vpack.c.bf16 %v1034_v21, %v1033_v20 }
 0x37f   : > { %v1654_v1 = vpop.f32.mrb[4].mxu0 }
 0x380   : > { %v861_v2 = vpop.f32.mrb[5].mxu0  ;;  %v871_v4 = vmul.f32 0.25, %v1654_v1  ;;  %v1020_v1 = vsub.s32 1, %v2222_v62 }
 0x381   : > { %v870_v3 = vmul.f32 0.25, %v861_v2  ;;  %v1015_v2 = vrot.slane %v1011_v0, %v1014_v63 }
 0x382   : > { %v875_v6 = vsel %vm788_vm5, %v871_v4, -inf }
 0x383   : > { %v872_v5 = vsel %vm788_vm5, %v870_v3, -inf }
 0x384   : > { %873 = vmax.xlane.f32.xlu0 %v872_v5 }
 0x388   : > { %876 = vmax.xlane.f32.xlu0 %v875_v6  ;;  %v1021_v6 = vrot.slane %v1011_v0, %v1020_v1 }
 0x411   : > { %v874_v7 = vpop.xlane.xlu0 %873 }
 0x412   : > { %v878_v8 = vsub.f32 %v870_v3, %v874_v7 }
 0x414   : > { %v880_v9 = vmul.f32 1.442695, %v878_v8 }
 0x415   : > { %v877_v10 = vpop.xlane.xlu0 %876 }
 0x416   : > { %1863 = vpow2.f32 %v880_v9  ;;  %v879_v11 = vsub.f32 %v871_v4, %v877_v10 }
 0x418   : > { %v882_v12 = vmul.f32 1.442695, %v879_v11 }
 0x41a   : > { %1865 = vpow2.f32 %v882_v12  ;;  %v1029_v12 = vld [vmem:[%s2361_s9 + $0x10] sm:$0xff] }
 0x420   : > { %v1864_v13 = vpop.eup %1863 }
 0x421   : > { %v884_v14 = vsel %vm788_vm5, %v1864_v13, 0.0 }
 0x422   : > { %885 = vadd.xlane.f32.xlu1 %v884_v14 }
 0x424   : > { %v1866_v15 = vpop.eup %1865 }
 0x425   : > { %v887_v16 = vsel %vm788_vm5, %v1866_v15, 0.0 }
 0x426   : > { %888 = vadd.xlane.f32.xlu1 %v887_v16 }
 0x4af   : > { %v886_v23 = vpop.xlane.xlu1 %885 }
 0x4b0   : > { %1867 = vrcp.f32 %v886_v23  ;;  %v1206_v23 = vld [vmem:[%s2363_s11 + $0x8] sm:$0xff] }
 0x4b3   : > { %v889_v24 = vpop.xlane.xlu1 %888 }
 0x4b4   : > { %1869 = vrcp.f32 %v889_v24 }
 0x4ba   : > { %v1868_v25 = vpop.eup %1867 }
 0x4bb   : > { %v891_v26 = vmul.f32 16.0, %v1868_v25  ;;  %v1207_v25 = vld [vmem:[%s2363_s11 + $0x10] sm:$0xff] }
 0x4bd   : > { %v894_v27 = vmul.f32 %v1864_v13, %v891_v26  ;;  %v1030_v13 = vld [vmem:[%s2361_s9 + $0x18] sm:$0xff] }
 0x4be   : > { %v1870_v28 = vpop.eup %1869  ;;  %v1792_v16 = vpack.c.bf16 %v1030_v13, %v1029_v12  ;;  %v1208_v26 = vld [vmem:[%s2363_s11 + $0x18] sm:$0xff] }
 0x4bf   : > { %v896_v29 = vmul.f32 %v894_v27, %v2168_v56  ;;  %v893_v30 = vmul.f32 16.0, %v1870_v28  ;;  %v1026_v27 = vld [vmem:[%s2364_s12] sm:$0x3] }
 0x4c0   : > { %v1196_v28 = vrot.slane %v1026_v27, %v1014_v63 }
 0x4c1   : > { %v895_v31 = vmul.f32 %v1866_v15, %v893_v30  ;;  %1663 = vmatprep.mubr.msk.f32.mxu0 %vm788_vm5, %v896_v29 }
 0x4c3   : > { %v897_v32 = vmul.f32 %v895_v31, %v2170_v57 }
 0x4c5   : > { %1664 = vmatmul.mubr.msk.f32.vlgmr.msra.gmra.mrb[6].mxu0 %vm788_vm5, %v897_v32 }
 0x598   : > { %v1665_v33 = vpop.f32.mrb[6].mxu0 }
 0x599   : > { %v974_v34 = vpop.f32.mrb[7].mxu0  ;;  %v987_v35 = vsel %vm983_vm6, %v1665_v33, 0.0 }
 0x59a   : > { %988 = vadd.xlane.f32.xlu1 %v987_v35  ;;  %v984_v36 = vsel %vm983_vm6, %v974_v34, 0.0 }
 0x59b   : > { %985 = vadd.xlane.f32.xlu0 %v984_v36 }
 0x627   : > { %v989_v37 = vpop.xlane.xlu1 %988 }
 0x628   : > { %v992_v38 = vmul.f32 0.0625, %v989_v37  ;;  %v986_v39 = vpop.xlane.xlu0 %985  ;;  %v1300_v37 = vld [vmem:[%s2365_s13] sm:$0xff] }
 0x629   : > { %v991_v40 = vmul.f32 0.0625, %v986_v39 }
 0x62a   : > { %v994_v41 = vsub.f32 %v1665_v33, %v992_v38  ;;  %v1301_v38 = vld [vmem:[%s2365_s13 + $0x8] sm:$0xff] }
 0x62b   : > { %v993_v42 = vsub.f32 %v974_v34, %v991_v40  ;;  %v1812_v39 = vpack.c.bf16 %v1301_v38, %v1300_v37  ;;  %v1302_v40 = vld [vmem:[%s2365_s13 + $0x10] sm:$0xff] }
 0x62c   : > { %v996_v43 = vmul.f32 %v994_v41, %v994_v41 }
 0x62d   : > { %v995_v44 = vmul.f32 %v993_v42, %v993_v42 }
 0x62e   : > { %v1000_v45 = vsel %vm983_vm6, %v996_v43, 0.0  ;;  %v1212_v43 = vrot.slane %v1026_v27, %v1020_v1 }
 0x62f   : > { %1001 = vadd.xlane.f32.xlu1 %v1000_v45  ;;  %v997_v46 = vsel %vm983_vm6, %v995_v44, 0.0 }
 0x630   : > { %998 = vadd.xlane.f32.xlu0 %v997_v46 }
 0x6bc   : > { %v1002_v53 = vpop.xlane.xlu1 %1001 }
 0x6bd   : > { %v1004_v54 = vmul.f32 0.0625, %v1002_v53  ;;  %v999_v55 = vpop.xlane.xlu0 %998 }
 0x6be   : > { %v1003_v58 = vmul.f32 0.0625, %v999_v55 }
 0x6bf   : > { %v1006_v60 = vadd.f32 1e-05, %v1004_v54 }
 0x6c0   : > { %v1005_v61 = vadd.f32 1e-05, %v1003_v58 }
 0x6c1   : > { %1871 = vrsqrt.f32 %v1006_v60 }
 0x6c2   : > { %1873 = vrsqrt.f32 %v1005_v61 }
 0x6cb   : > { %v1872_v3 = vpop.eup %1871 }
 0x6cc   : > { %v1874_v4 = vpop.eup %1873  ;;  %v1010_v5 = vmul.f32 %v1872_v3, %v994_v41  ;;  %v1303_v41 = vld [vmem:[%s2365_s13 + $0x18] sm:$0xff] }
 0x6cd   : > { %v1009_v7 = vmul.f32 %v1874_v4, %v993_v42  ;;  %v1816_v42 = vpack.c.bf16 %v1303_v41, %v1302_v40 }
 0x6ce   : > { %v1017_v8 = vmul.f32 %v1015_v2, %v1010_v5 }
 0x6cf   : > { %v1016_v9 = vmul.f32 %v1015_v2, %v1009_v7 }
 0x6d0   : > { %v1023_v10 = vadd.f32 %v1021_v6, %v1017_v8 }
 0x6d1   : > { %v1022_v11 = vadd.f32 %v1021_v6, %v1016_v9 }
 0x6d2   : > { %v1025_v15 = vmax.f32 %v1023_v10, 0.0 }
 0x6d3   : > { %v1024_v14 = vmax.f32 %v1022_v11, 0.0 }
 0x6d5   : > { %1670 = vmatprep.mubr.msk.f32.mxu1 %vm983_vm6, %v1024_v14 }
 0x6d6   : > { %1671 = vmatmul.mubr.msk.f32.vlgmr.msra.gmra.mrb[2].mxu1 %vm983_vm6, %v1025_v15 }
 0x6d7   : > { %1791 = vmatpush3.bf16.msra.mxu1 %v1788_v52  ;;  %1689 = vmatprep.mubr.msk.f32.mxu1 %vm700_vm4, %v2168_v56  ;;  %v1205_v56 = vld [vmem:[%s2363_s11] sm:$0xff] }
 0x6d8   : > { %1793 = vmatprep.subr.bf16.mxu1 %v1792_v16  ;;  %v1804_v24 = vpack.c.bf16 %v1206_v23, %v1205_v56  ;;  %v1500_v52 = vld [vmem:[%s2365_s13 + $0x20] ss:$0 sm:$0xff] }
 0x6da   : > { %1805 = vmatprep.subr.bf16.mxu0 %v1804_v24 }
 0x6db   : > { %1795 = vmatpush3.bf16.msra.mxu1 %v1792_v16  ;;  %1807 = vmatpush3.bf16.msra.mxu0 %v1804_v24 }
 0x6dc   : > { %1797 = vmatprep.subr.bf16.mxu1 %v1796_v19 }
 0x6df   : > { %1799 = vmatpush3.bf16.msra.mxu1 %v1796_v19 }
 0x6e0   : > { %1801 = vmatprep.subr.bf16.mxu1 %v1800_v22 }
 0x6e3   : > { %1803 = vmatpush3.bf16.msra.mxu1 %v1800_v22 }
 0x6e6   : > { %1690 = vmatmul.mubr.msk.f32.vlgmr.msra.gmra.mrb[2].mxu1 %vm700_vm4, %v2170_v57  ;;  %v1808_v57 = vpack.c.bf16 %v1208_v26, %v1207_v25 }
 0x6e8   : > { %1809 = vmatprep.subr.bf16.mxu0 %v1808_v57 }
 0x6e9   : > { %1811 = vmatpush3.bf16.msra.mxu0 %v1808_v57 }
 0x6ea   : > { %1813 = vmatprep.subr.bf16.mxu0 %v1812_v39 }
 0x7b9   : > { %v1691_v29 = vpop.f32.mrb[2].mxu1 }
 0x7ba   : > { %v1198_v30 = vadd.f32 %v1691_v29, %v1196_v28  ;;  %v1184_v31 = vpop.f32.mrb[3].mxu1 }
 0x7bb   : > { %v1197_v32 = vadd.f32 %v1196_v28, %v1184_v31 }
 0x7bc   : > { %v1202_v33 = vmul.f32 0.01, %v1198_v30  ;;  %vm1200_vm7 = vcmp.gt.f32.partialorder %v1198_v30, 0.0 }
 0x7bd   : > { %vm1199_vm8 = vcmp.gt.f32.partialorder %v1197_v32, 0.0  ;;  %v1201_v34 = vmul.f32 0.01, %v1197_v32 }
 0x7be   : > { %v1204_v36 = vsel %vm1200_vm7, %v1198_v30, %v1202_v33 }
 0x7bf   : > { %v1203_v35 = vsel %vm1199_vm8, %v1197_v32, %v1201_v34 }
 0x7c0   : > { %1700 = vmatprep.mubr.msk.f32.mxu0 %vm788_vm5, %v1203_v35 }
 0x7c1   : > { %1701 = vmatmul.mubr.msk.f32.vlgmr.msra.gmra.mrb[8].mxu0 %vm788_vm5, %v1204_v36 }
 0x7c2   : > { %1815 = vmatpush3.bf16.msra.mxu0 %v1812_v39 }
 0x7c3   : > { %1817 = vmatprep.subr.bf16.mxu0 %v1816_v42 }
 0x7c6   : > { %1819 = vmatpush3.bf16.msra.mxu0 %v1816_v42 }
 0x894   : > { %v1702_v44 = vpop.f32.mrb[8].mxu0 }
 0x895   : > { %v1291_v45 = vadd.f32 %v1702_v44, %v1212_v43  ;;  %v1285_v46 = vpop.f32.mrb[9].mxu0 }
 0x896   : > { %v1286_v47 = vadd.f32 %v1285_v46, %v1212_v43 }
 0x897   : > { %v1297_v48 = vmul.f32 0.01, %v1291_v45  ;;  %vm1295_vm9 = vcmp.gt.f32.partialorder %v1291_v45, 0.0 }
 0x898   : > { %vm1294_vm10 = vcmp.gt.f32.partialorder %v1286_v47, 0.0  ;;  %v1296_v49 = vmul.f32 0.01, %v1286_v47 }
 0x899   : > { %v1299_v51 = vsel %vm1295_vm9, %v1291_v45, %v1297_v48 }
 0x89a   : > { %v1298_v50 = vsel %vm1294_vm10, %v1286_v47, %v1296_v49 }
 0x89b   : > { %1711 = vmatprep.mubr.msk.f32.mxu0 %vm788_vm5, %v1298_v50 }
 0x89c   : > { %1712 = vmatmul.mubr.msk.f32.vlgmr.msra.gmra.mrb[10].mxu0 %vm788_vm5, %v1299_v51 }
 0x96f   : > { %v1713_v53 = vpop.f32.mrb[10].mxu0 }
 0x970   : > { %v1387_v54 = vadd.f32 %v1713_v53, %v1500_v52  ;;  %v1381_v55 = vpop.f32.mrb[11].mxu0 }
 0x971   : > { %v1382_v58 = vadd.f32 %v1500_v52, %v1381_v55 }
 0x972   : > { %1875 = vtanh.f32 %v1387_v54 }
 0x973   : > { %1877 = vtanh.f32 %v1382_v58 }
 0x978   : > { %1401 = sbr.rel (!%p2060_p5) target bundleno = 2459 (0x99b), region = 80 }
 0x97c   : > { %v1876_v59 = vpop.eup %1875 }
 0x97d   : > { %v1878_v60 = vpop.eup %1877  ;;  %1393 = vst [vmem:[%s473_s28 + $0x8] sm:$0xff] %v1876_v59 }
 0x97e   : > { %1392 = vst [vmem:[%s473_s28] sm:$0xff] %v1878_v60 }
 0x97f   : > { %s2386_s24 = smov (!%p1404_p11, %s1403_s24), 2 }
 0x980   : > { %s2297_s15 = sshll.u32 %s2386_s24, 7 }
 0x981   : > { %s1408_s20 = ssub.s32 256, %s2297_s15 }
 0x982   : > { %1409 = vsyncadd %s2292_s19, %s1408_s20  ;;  %p1506_p12 = scmp.ne.s32.totalorder %s2297_s15, 0  ;;  %s1512_s21 = sshll.u32 %s2043_s17, 8 }
 0x983   : > { %s2306_s23 = scalar_lea.hbm %s2366_s14, %s1512_s21  ;;  %s1414_s27 = sshll.u32 %s473_s28, 4  ;;  %s2308_s27 = int_to_ptr.vmem [resolvable:$true] %s1414_s27 }
 0x984   : > { %s1879_s18 = scalar_lea.vmem %s2308_s27, %s2297_s15  ;;  %s1944_s1 = smov [#allocation2]  }
 0x985   : > { %p1880_p13 = scmp.ne.s32.totalorder %s2308_s27, %s1879_s18  ;;  %s1883_s22 = sshll.u32 %s1944_s1, 4  ;;  %s1884_s22 = int_to_ptr.vmem [resolvable:$false] %s1883_s22 }
 0x986   : > { %s1885_s17 = scalar_lea.vmem %s1884_s22, 512  ;;  %p1886_p2 = scmp.lt.s32.totalorder %s2308_s27, %s1884_s22 }
 0x987   : > { %p1881_p0 = pnand %p1880_p13, %p1506_p12  ;;  %p1887_p3 = scmp.lt.s32.totalorder %s1885_s17, %s1879_s18 }
 0x989   : > { %p1882_p1 = pneg %p1881_p0  ;;  %p1888_p4 = por %p1887_p3, %p1886_p2 }
 0x98b   : > { %p1889_p5 = pnand %p1888_p4, %p1882_p1 }
 0x98d   : > { %1892 = shalt.err (!%p1889_p5)
}
 0x98e   : > { %s1893_s28 = scalar_lea.hbm %s2306_s23, %s2297_s15  ;;  %s1897_s21 = scalar_lea.hbm %s2366_s14, 384 }
 0x98f   : > { %p1894_p7 = scmp.ne.s32.totalorder %s2306_s23, %s1893_s28  ;;  %p1898_p10 = scmp.lt.u32.totalorder %s2306_s23, %s2366_s14 }
 0x990   : > { %p1899_p11 = scmp.lt.u32.totalorder %s1897_s21, %s1893_s28  ;;  %p1901_p0 = scmp.lt.u32.totalorder %s1893_s28, %s2306_s23 }
 0x991   : > { %p1895_p8 = pnand %p1894_p7, %p1506_p12 }
 0x992   : > { %p1900_p13 = por %p1899_p11, %p1898_p10 }
 0x993   : > { %p1896_p9 = pneg %p1895_p8 }
 0x994   : > { %p1902_p1 = por %p1901_p0, %p1900_p13 }
 0x996   : > { %p1903_p2 = pnand %p1902_p1, %p1896_p9 }
 0x998   : > { %1906 = shalt.err (!%p1903_p2)
}
 0x999   : > { %s1945_s18 = smov 128   ;;  %s1946_s1 = smov 8  }
 0x99a   : > { %1420 = dma.vmem_to_hbm [thread:$0]  (%p1506_p12), %s2308_s27, %s2297_s15, %s2306_s23, %s2292_s19, %s1945_s18, %s1945_s18, %s1946_s1  }
 0x99b PF: > { %p1827_p3 = scmp.ge.s32.totalorder %s1941_s16, 2  ;;  %s1429_s17 = sand.u32 1, %s1929_s29  }
 0x99c   : > { %s1430_s28 = scalar_lea.sflag [#allocation3], %s1429_s17 }
 0x99d   : > { %p1824_p4 = pnand %p1827_p3, %p2064_p6 }
 0x99f   : > { %1924 = dma.done.wait (!%p1824_p4), %s1430_s28, 256  }
 0x9a0   : > { %1926 = vsyncadd (!%p1824_p4), %s1430_s28, 4294967040  ;;  %s2380_s16 = sld [smem:[#allocation6_spill]]  ;;  %s2381_s24 = sld [smem:[#allocation5_spill]] }
 0x9a1   : > { %s2382_s15 = sld [smem:[#allocation7_spill]]  ;;  %s2383_s29 = smov %s1933_s30 }
 0x9a6   : > { %p24_p5 = scmp.ge.s32.totalorder %s2380_s16, 4   ;;  %s2384_s30 = smov %s2381_s24 }
 0x9a8   :  { %26 = sbr.rel (!%p24_p5) target bundleno = 5 (0x5), region = 111 }
 0x9af   :  { %1435 = vsyncpa [#allocation3], 1 }
 0x9b0   :  { %1437 = vsyncpa [#allocation3 + $0x1], 1 }

</bundles_post_ra>
